<compile_context>
chip_gen: v7x
topology: tpu7x:2x2x1
jax: 0.10.0
libtpu: 0.0.40
codegen_flags: <defaults>
</compile_context>

<pallas_src>
import jax
import jax.numpy as jnp
from jax.experimental import pallas as pl
from jax.experimental.pallas import tpu as pltpu

_LANES = 128


def _make_sine_kernel(w0: float):
    def _sine_kernel(x_ref, o_ref):
        x = x_ref[...]
        # Python-float w0 is weakly typed: bf16 tiles stay bf16 on v6e/v7x,
        # f32 tiles stay f32.  Explicit cast keeps the store dtype exact.
        o_ref[...] = jnp.sin(x * w0).astype(o_ref.dtype)

    return _sine_kernel


def sine(x: jax.Array, w0: float = 1.0, *, target_block_bytes: int = 2 << 20) -> jax.Array:
    """Pallas TPU implementation of torch.sin(w0 * x). Works for any shape."""
    orig_shape = x.shape
    dtype = x.dtype
    n = x.size

    itemsize = jnp.dtype(dtype).itemsize
    # Native sublane packing: 8 rows for 4-byte, 16 for 2-byte, 32 for 1-byte.
    sublane_mult = max(8, 32 // itemsize)

    rows = pl.cdiv(n, _LANES)
    pad = rows * _LANES - n

    x_flat = x.reshape(-1)
    if pad:
        # Extra HBM pass only when the size isn't lane-aligned.
        x_flat = jnp.pad(x_flat, (0, pad))
    x2d = x_flat.reshape(rows, _LANES)

    # Row tile: ~target_block_bytes per block, sublane-aligned, never bigger
    # than the (rounded-up) row count.
    tr = max(sublane_mult, target_block_bytes // (_LANES * itemsize))
    tr = (tr // sublane_mult) * sublane_mult
    rows_rounded = pl.cdiv(rows, sublane_mult) * sublane_mult
    tr = min(tr, rows_rounded)

    grid = (pl.cdiv(rows, tr),)  # partial last block masked by Pallas

    out2d = pl.pallas_call(
        _make_sine_kernel(float(w0)),
        out_shape=jax.ShapeDtypeStruct((rows, _LANES), dtype),
        grid=grid,
        in_specs=[pl.BlockSpec((tr, _LANES), lambda i: (i, 0))],
        out_specs=pl.BlockSpec((tr, _LANES), lambda i: (i, 0)),
        compiler_params=pltpu.CompilerParams(
            dimension_semantics=("parallel",)),
    )(x2d)

    if pad:
        return out2d.reshape(-1)[:n].reshape(orig_shape)
    return out2d.reshape(orig_shape)


if __name__ == "__main__":
    key = jax.random.PRNGKey(0)
    w0 = 30.0  # typical SIREN w0; module default is 1.0 but any scalar works

    # Main case: small NCHW input, lane-aligned size (no padding path).
    x = jax.random.normal(key, (2, 4, 16, 16), dtype=jnp.float32)
    y = jax.block_until_ready(sine(x, w0))
    ref = jnp.sin(w0 * x)
    assert y.shape == x.shape and y.dtype == x.dtype
    assert jnp.allclose(y, ref, atol=1e-5, rtol=1e-5)

    # Odd-sized case: exercises the pad + masked-tail path.
    x_odd = jax.random.normal(jax.random.PRNGKey(1), (3, 5, 7), dtype=jnp.float32)
    y_odd = jax.block_until_ready(sine(x_odd, w0))
    ref_odd = jnp.sin(w0 * x_odd)
    assert y_odd.shape == x_odd.shape and y_odd.dtype == x_odd.dtype
    assert jnp.allclose(y_odd, ref_odd, atol=1e-5, rtol=1e-5)

    print("KERNEL_OK")
</pallas_src>

<mosaic_0001>
module attributes {stable_mosaic.version = 11 : i64} {
  func.func @_sine_kernel(%arg0: i32, %arg1: memref<16x128xf32, #tpu.memory_space<vmem>>, %arg2: memref<16x128xf32, #tpu.memory_space<vmem>>) attributes {dimension_semantics = [#tpu.dimension_semantics<parallel>], iteration_bounds = array<i64: 1>, scalar_prefetch = 0 : i64, scratch_operands = 0 : i64, tpu.core_type = #tpu.core_type<tc>, window_params = [{transform_indices = @transform_0, window_bounds = array<i64: 16, 128>}, {transform_indices = @transform_1, window_bounds = array<i64: 16, 128>}]} {
    %c0 = arith.constant 0 : index
    %c0_0 = arith.constant 0 : index
    %0 = vector.load %arg1[%c0, %c0_0] : memref<16x128xf32, #tpu.memory_space<vmem>>, vector<16x128xf32>
    %cst = arith.constant 3.000000e+01 : f32
    %1 = vector.broadcast %cst : f32 to vector<16x128xf32>
    %2 = arith.mulf %0, %1 : vector<16x128xf32>
    %3 = math.sin %2 : vector<16x128xf32>
    %c0_1 = arith.constant 0 : index
    %c0_2 = arith.constant 0 : index
    %4 = vector.load %arg2[%c0_1, %c0_2] : memref<16x128xf32, #tpu.memory_space<vmem>>, vector<16x128xf32>
    tpu.vector_store %arg2[%c0_1, %c0_2], %3 {strides = array<i32>} : memref<16x128xf32, #tpu.memory_space<vmem>>, vector<16x128xf32>,
    return
  }
  func.func @transform_0(%arg0: i32) -> (i32, i32) {
    %c0_i32 = arith.constant 0 : i32
    %c0_i32_0 = arith.constant 0 : i32
    return %arg0, %c0_i32 : i32, i32
  }
  func.func @transform_1(%arg0: i32) -> (i32, i32) {
    %c0_i32 = arith.constant 0 : i32
    %c0_i32_0 = arith.constant 0 : i32
    return %arg0, %c0_i32 : i32, i32
  }
}

</mosaic_0001>

<bundles_post_ra>
// kernel: tpu_custom_call.1
= control target key start
LH: loop header
LB: loop body
LE: loop exit
PB: predicated region body
PF: predicated region fallthrough
CT: control target
= control target key end

     0   :  { %6 = vsyncpa [#allocation3], 0  ;;  %s456_s0 = inlined_call_operand.hbm [shape: f32[16,128], index: 0, kind: input, shape index: {}]   ;;  %s457_s1 = inlined_call_operand.hbm [shape: f32[16,128], index: 1, kind: output, shape index: {}]  }
   0x1   :  { %7 = vsyncpa [#allocation4], 0  ;;  %s336_s6 = smov [#allocation2]   ;;  %s288_s10 = scalar_lea.hbm %s456_s0, 256 }
   0x2   :  { %s13_s7 = sshll.u32 %s336_s6, 4  ;;  %p289_p0 = scmp.ne.s32.totalorder %s456_s0, %s288_s10  ;;  %s14_s7 = int_to_ptr.vmem [resolvable:$true] %s13_s7 }
   0x3   :  { %p292_p1 = scmp.lt.u32.totalorder %s288_s10, %s456_s0 }
   0x5   :  { %p294_p2 = pnand %p292_p1, %p289_p0 }
   0x7   :  { %297 = shalt.err (!%p294_p2)
}
   0x8   :  { %s298_s15 = scalar_lea.vmem %s14_s7, 256  ;;  %p303_p4 = scmp.lt.s32.totalorder %s14_s7, %s14_s7 }
   0x9   :  { %p299_p3 = scmp.ne.s32.totalorder %s14_s7, %s298_s15  ;;  %p304_p5 = scmp.lt.s32.totalorder %s298_s15, %s298_s15 }
   0xb   :  { %p305_p6 = por %p304_p5, %p303_p4 }
   0xd   :  { %p306_p7 = pnand %p305_p6, %p299_p3 }
   0xf   :  { %309 = shalt.err (!%p306_p7)
}
  0x10   :  { %s337_s16 = smov 128   ;;  %s338_s17 = smov 8  }
  0x11   :  { %19 = dma.hbm_to_vmem [thread:$0]  %s456_s0, 256, %s14_s7, [#allocation3], %s337_s16, %s337_s16, %s338_s17  }
  0x12   :  { %332 = dma.done.wait [#allocation3], 256  }
  0x13   :  { %333 = vsyncadd [#allocation3], 4294967040  ;;  %v23_v0 = vld [vmem:[#allocation2] sm:$0xff]  ;;  %v24_v1 = vld [vmem:[#allocation2 + $0x8] sm:$0xff]  ;;  %v339_v26 = vmov 683565275  }
  0x14   :  { %v371_v2 = vmul.f32 30.0, %v23_v0  ;;  %v373_v3 = vmul.f32 30.0, %v24_v1  ;;  %v340_v28 = vmov 2475754826   ;;  %v341_v30 = vmov 2131351028  }
  0x15   :  { %v342_v32 = vmov 2102212464   ;;  %v343_v34 = vmov 920167782   ;;  %v344_v42 = vmov 1326507024  }
  0x16   :  { %v27_v4 = vand.u32 2147483647, %v371_v2  ;;  %v30_v5 = vand.u32 2139095040, %v371_v2  ;;  %v131_v6 = vand.u32 2147483647, %v373_v3  ;;  %v134_v7 = vand.u32 2139095040, %v373_v3 }
  0x17   :  { %vm29_vm14 = vcmp.lt.s32.totalorder %v371_v2, 0  ;;  %s345_s0 = smov [#allocation5]  }
  0x18   :  { %v31_v8 = vshrl.u32 %v30_v5, 23  ;;  %v34_v9 = vand.u32 8388607, %v27_v4  ;;  %v135_v10 = vshrl.u32 %v134_v7, 23  ;;  %v138_v11 = vand.u32 8388607, %v131_v6 }
  0x19   :  { %vm28_vm15 = vcmp.le.f32.partialorder %v27_v4, 0.7853982  ;;  %s242_s20 = sshll.u32 %s345_s0, 4  ;;  %s243_s20 = int_to_ptr.vmem [resolvable:$true] %s242_s20 }
  0x1a   :  { %v254_v12 = vadd.s32 4294967169, %v31_v8  ;;  %v258_v13 = vadd.s32 4294967169, %v135_v10  ;;  %v35_v15 = vor.u32 8388608, %v34_v9  ;;  %v139_v16 = vor.u32 8388608, %v138_v11  ;;  %s310_s21 = scalar_lea.vmem %s243_s20, 256  ;;  %p315_p9 = scmp.lt.s32.totalorder %s243_s20, %s243_s20 }
  0x1b   :  { %p311_p8 = scmp.ne.s32.totalorder %s243_s20, %s310_s21  ;;  %p316_p10 = scmp.lt.s32.totalorder %s310_s21, %s310_s21 }
  0x1c   :  { %v37_v14 = vadd.s32 1, %v254_v12  ;;  %v141_v17 = vadd.s32 1, %v258_v13  ;;  %v383_v22 = vshll.u32 %v35_v15, 8  ;;  %v385_v24 = vshll.u32 %v139_v16, 8 }
  0x1d   :  { %p317_p11 = por %p316_p10, %p315_p9 }
  0x1e   :  { %vm38_vm0 = vcmp.gt.s32.totalorder %v37_v14, 0  ;;  %vm142_vm1 = vcmp.gt.s32.totalorder %v141_v17, 0 }
  0x1f   :  { %v39_v18 = vsel %vm38_vm0, %v37_v14, 0  ;;  %v143_v21 = vsel %vm142_vm1, %v141_v17, 0  ;;  %vm133_vm0 = vcmp.lt.s32.totalorder %v373_v3, 0  ;;  %vm132_vm1 = vcmp.le.f32.partialorder %v131_v6, 0.7853982  ;;  %p318_p12 = pnand %p317_p11, %p311_p8 }
  0x20   :  { %v40_v19 = vshrl.u32 %v39_v18, 5  ;;  %v41_v20 = vand.u32 31, %v39_v18  ;;  %v145_v23 = vand.u32 31, %v143_v21  ;;  %v387_v36 = vshrl.u32 %v143_v21, 5 }
  0x22   :  { %v42_v25 = vsub.s32 32, %v41_v20  ;;  %v44_v27 = vshll.u32 %v339_v26, %v41_v20  ;;  %v47_v29 = vshll.u32 %v340_v28, %v41_v20  ;;  %v50_v31 = vshll.u32 %v341_v30, %v41_v20 }
  0x23   :  { %v53_v33 = vshll.u32 %v342_v32, %v41_v20  ;;  %v56_v35 = vshll.u32 %v343_v34, %v41_v20  ;;  %vm59_vm2 = vcmp.lt.s32.totalorder %v40_v19, 1  ;;  %vm60_vm3 = vcmp.lt.s32.totalorder %v40_v19, 2 }
  0x24   :  { %v43_v37 = vshrl.u32 %v339_v26, %v42_v25  ;;  %v45_v38 = vshrl.u32 %v340_v28, %v42_v25  ;;  %v48_v39 = vshrl.u32 %v341_v30, %v42_v25  ;;  %v51_v40 = vshrl.u32 %v342_v32, %v42_v25 }
  0x25   :  { %v54_v41 = vshrl.u32 %v343_v34, %v42_v25  ;;  %v57_v43 = vshrl.u32 %v344_v42, %v42_v25  ;;  %vm62_vm4 = vcmp.lt.s32.totalorder %v40_v19, 4  ;;  %v146_v47 = vsub.s32 32, %v145_v23 }
  0x26   :  { %v46_v44 = vor.u32 %v45_v38, %v44_v27  ;;  %v49_v45 = vor.u32 %v48_v39, %v47_v29  ;;  %v52_v46 = vor.u32 %v51_v40, %v50_v31  ;;  %vm61_vm5 = vcmp.lt.s32.totalorder %v40_v19, 3 }
  0x27   :  { %v55_v48 = vor.u32 %v54_v41, %v53_v33  ;;  %v58_v49 = vor.u32 %v57_v43, %v56_v35  ;;  %v148_v50 = vshll.u32 %v339_v26, %v145_v23  ;;  %v151_v58 = vshll.u32 %v340_v28, %v145_v23 }
  0x28   :  { %v63_v51 = vsel %vm59_vm2, %v43_v37, %v46_v44  ;;  %v64_v52 = vsel %vm62_vm4, %v52_v46, 2102212464  ;;  %v67_v53 = vsel %vm59_vm2, %v46_v44, %v49_v45  ;;  %v71_v54 = vsel %vm59_vm2, %v49_v45, %v52_v46 }
  0x29   :  { %v65_v55 = vsel %vm61_vm5, %v49_v45, %v64_v52  ;;  %v68_v56 = vsel %vm62_vm4, %v55_v48, 920167782  ;;  %v72_v57 = vsel %vm62_vm4, %v58_v49, 1326507024  ;;  %v147_v61 = vshrl.u32 %v339_v26, %v146_v47 }
  0x2a   :  { %v69_v59 = vsel %vm61_vm5, %v52_v46, %v68_v56  ;;  %v73_v60 = vsel %vm61_vm5, %v55_v48, %v72_v57  ;;  %v149_v62 = vshrl.u32 %v340_v28, %v146_v47  ;;  %v66_v63 = vsel %vm60_vm3, %v63_v51, %v65_v55 }
  0x2b   :  { %v70_v0 = vsel %vm60_vm3, %v67_v53, %v69_v59  ;;  %v74_v1 = vsel %vm60_vm3, %v71_v54, %v73_v60  ;;  %v152_v5 = vshrl.u32 %v341_v30, %v146_v47  ;;  %v154_v13 = vshll.u32 %v341_v30, %v145_v23 }
  0x2c   :  { %v396_v7 = vmul.u32.u64.low %v383_v22, %v74_v1  ;;  %v397_v8 = vmul.u32.u64.high %v383_v22, %v74_v1, %v396_v7  ;;  %v400_v9 = vmul.u32.u64.low %v383_v22, %v70_v0  ;;  %v401_v10 = vmul.u32.u64.high %v383_v22, %v70_v0, %v400_v9 }
  0x2d   :  { %v150_v11 = vor.u32 %v149_v62, %v148_v50  ;;  %v153_v12 = vor.u32 %v152_v5, %v151_v58  ;;  %v155_v14 = vshrl.u32 %v342_v32, %v146_v47  ;;  %v157_v15 = vshll.u32 %v342_v32, %v145_v23 }
  0x2e   :  { %v158_v16 = vshrl.u32 %v343_v34, %v146_v47  ;;  %v160_v17 = vshll.u32 %v343_v34, %v145_v23  ;;  %v161_v18 = vshrl.u32 %v344_v42, %v146_v47  ;;  %v82_v19 = vmul.u32 %v383_v22, %v66_v63 }
  0x2f   :  { %v156_v20 = vor.u32 %v155_v14, %v154_v13  ;;  %vm163_vm6 = vcmp.lt.s32.totalorder %v387_v36, 1  ;;  %vm164_vm7 = vcmp.lt.s32.totalorder %v387_v36, 2  ;;  %vm84_vm8 = vc.u32 %v397_v8, %v400_v9 }
  0x30   :  { %v85_v21 = vadd.s32 1, %v401_v10  ;;  %v159_v25 = vor.u32 %v158_v16, %v157_v15  ;;  %vm165_vm9 = vcmp.lt.s32.totalorder %v387_v36, 3  ;;  %v162_v26 = vor.u32 %v161_v18, %v160_v17 }
  0x31   :  { %vm166_vm10 = vcmp.lt.s32.totalorder %v387_v36, 4  ;;  %v167_v27 = vsel %vm163_vm6, %v147_v61, %v150_v11  ;;  %v171_v23 = vsel %vm163_vm6, %v150_v11, %v153_v12  ;;  %v175_v30 = vsel %vm163_vm6, %v153_v12, %v156_v20 }
  0x32   :  { %v86_v28 = vsel %vm84_vm8, %v85_v21, %v401_v10  ;;  %v168_v22 = vsel %vm166_vm10, %v156_v20, 2102212464  ;;  %v172_v29 = vsel %vm166_vm10, %v159_v25, 920167782  ;;  %v176_v34 = vsel %vm166_vm10, %v162_v26, 1326507024 }
  0x33   :  { %v87_v31 = vadd.s32 %v86_v28, %v82_v19  ;;  %v169_v32 = vsel %vm165_vm9, %v153_v12, %v168_v22  ;;  %v173_v33 = vsel %vm165_vm9, %v156_v20, %v172_v29  ;;  %v177_v38 = vsel %vm165_vm9, %v159_v25, %v176_v34 }
  0x34   :  { %v170_v35 = vsel %vm164_vm7, %v167_v27, %v169_v32  ;;  %v174_v37 = vsel %vm164_vm7, %v171_v23, %v173_v33  ;;  %v178_v40 = vsel %vm164_vm7, %v175_v30, %v177_v38  ;;  %v83_v59 = vadd.s32 %v400_v9, %v397_v8 }
  0x35   :  { %v88_v39 = vadd.s32 536870912, %v87_v31  ;;  %v418_v41 = vmul.u32.u64.low %v385_v24, %v174_v37  ;;  %v419_v42 = vmul.u32.u64.high %v385_v24, %v174_v37, %v418_v41  ;;  %v186_v46 = vmul.u32 %v385_v24, %v170_v35 }
  0x36   :  { %v422_v43 = vmul.u32.u64.low %v385_v24, %v178_v40  ;;  %v423_v44 = vmul.u32.u64.high %v385_v24, %v178_v40, %v422_v43  ;;  %vm119_vm5 = vweird.f32 %v371_v2  ;;  %vm223_vm9 = vweird.f32 %v373_v3 }
  0x37   :  { %v89_v45 = vshrl.u32 %v88_v39, 30  ;;  %v189_v48 = vadd.s32 1, %v419_v42 }
  0x38   :  { %vm188_vm11 = vc.u32 %v423_v44, %v418_v41  ;;  %v187_v15 = vadd.s32 %v418_v41, %v423_v44 }
  0x39   :  { %v90_v47 = vshll.u32 %v89_v45, 30  ;;  %v190_v36 = vsel %vm188_vm11, %v189_v48, %v419_v42  ;;  %v113_v8 = vsub.s32 4, %v89_v45 }
  0x3a   :  { %v191_v50 = vadd.s32 %v190_v36, %v186_v46 }
  0x3b   :  { %v91_v49 = vsub.s32 %v87_v31, %v90_v47  ;;  %v114_v27 = vsel %vm29_vm14, %v113_v8, %v89_v45 }
  0x3c   :  { %v192_v52 = vadd.s32 536870912, %v191_v50  ;;  %v116_v30 = vsel %vm28_vm15, 0, %v114_v27 }
  0x3d   :  { %v93_v51 = vsub.s32 0, %v91_v49  ;;  %v120_v35 = vadd.s32 3, %v116_v30 }
  0x3e   :  { %v193_v54 = vshrl.u32 %v192_v52, 30 }
  0x3f   :  { %v255_v53 = vmin.u32 %v93_v51, %v91_v49  ;;  %v121_v39 = vand.u32 3, %v120_v35 }
  0x40   :  { %v194_v56 = vshll.u32 %v193_v54, 30  ;;  %v217_v34 = vsub.s32 4, %v193_v54 }
  0x41   :  { %v95_v55 = vclz %v255_v53  ;;  %vm126_vm2 = vcmp.eq.s32.totalorder %v121_v39, 2  ;;  %vm123_vm3 = vcmp.eq.s32.totalorder %v121_v39, 0  ;;  %vm122_vm4 = vcmp.lt.s32.totalorder %v121_v39, 2 }
  0x42   :  { %v195_v58 = vsub.s32 %v191_v50, %v194_v56  ;;  %v218_v38 = vsel %vm133_vm0, %v217_v34, %v193_v54 }
  0x43   :  { %v256_v57 = vadd.s32 4294967294, %v95_v55  ;;  %v220_v42 = vsel %vm132_vm1, 0, %v218_v38 }
  0x44   :  { %v197_v60 = vsub.s32 0, %v195_v58  ;;  %v224_v46 = vadd.s32 3, %v220_v42 }
  0x45   :  { %vm257_vm12 = vcmp.lt.s32.totalorder %v256_v57, 0 }
  0x46   :  { %v98_v24 = vsel %vm257_vm12, 0, %v256_v57  ;;  %v259_v0 = vmin.u32 %v197_v60, %v195_v58  ;;  %v225_v36 = vand.u32 3, %v224_v46 }
  0x47   :  { %v99_v61 = vsub.s32 32, %v98_v24  ;;  %v100_v62 = vshll.u32 %v91_v49, %v98_v24  ;;  %v103_v63 = vsub.s32 4294967266, %v98_v24 }
  0x48   :  { %v199_v7 = vclz %v259_v0  ;;  %vm230_vm6 = vcmp.eq.s32.totalorder %v225_v36, 2  ;;  %vm227_vm7 = vcmp.eq.s32.totalorder %v225_v36, 0  ;;  %vm226_vm8 = vcmp.lt.s32.totalorder %v225_v36, 2 }
  0x49   :  { %v101_v1 = vshrl.u32 %v83_v59, %v99_v61  ;;  %v104_v5 = vadd.s32 127, %v103_v63 }
  0x4a   :  { %v260_v12 = vadd.s32 4294967294, %v199_v7 }
  0x4b   :  { %v102_v10 = vor.u32 %v101_v1, %v100_v62  ;;  %v105_v11 = vshll.u32 %v104_v5, 23 }
  0x4c   :  { %vm261_vm13 = vcmp.lt.s32.totalorder %v260_v12, 0 }
  0x4d   :  { %v106_v13 = vor.u32 4788187, %v105_v11  ;;  %v109_v14 = vcvt.s32.f32 %v102_v10  ;;  %v202_v9 = vsel %vm261_vm13, 0, %v260_v12 }
  0x4e   :  { %v203_v17 = vsub.s32 32, %v202_v9  ;;  %v204_v18 = vshll.u32 %v195_v58, %v202_v9  ;;  %v207_v19 = vsub.s32 4294967266, %v202_v9 }
  0x4f   :  { %v107_v16 = vand.u32 2147483647, %v106_v13 }
  0x50   :  { %v205_v21 = vshrl.u32 %v187_v15, %v203_v17  ;;  %v208_v25 = vadd.s32 127, %v207_v19 }
  0x51   :  { %v110_v20 = vmul.f32 %v109_v14, %v107_v16 }
  0x52   :  { %v206_v23 = vor.u32 %v205_v21, %v204_v18  ;;  %v209_v28 = vshll.u32 %v208_v25, 23 }
  0x53   :  { %v111_v26 = vxor.u32 2147483648, %v110_v20 }
  0x54   :  { %v210_v31 = vor.u32 4788187, %v209_v28  ;;  %v213_v32 = vcvt.s32.f32 %v206_v23 }
  0x55   :  { %v112_v22 = vsel %vm29_vm14, %v111_v26, %v110_v20 }
  0x56   :  { %v115_v29 = vsel %vm28_vm15, %v371_v2, %v112_v22  ;;  %v211_v33 = vand.u32 2147483647, %v210_v31 }
  0x57   :  { %280 = vcosq.f32 %v115_v29 }
  0x58   :  { %282 = vsinq.f32 %v115_v29  ;;  %v214_v37 = vmul.f32 %v213_v32, %v211_v33 }
  0x5a   :  { %v215_v4 = vxor.u32 2147483648, %v214_v37 }
  0x5c   :  { %v216_v40 = vsel %vm133_vm0, %v215_v4, %v214_v37 }
  0x5d   :  { %v219_v41 = vsel %vm132_vm1, %v373_v3, %v216_v40 }
  0x5e   :  { %284 = vcosq.f32 %v219_v41 }
  0x5f   :  { %286 = vsinq.f32 %v219_v41 }
  0x61   :  { %v281_v43 = vpop.eup %280 }
  0x62   :  { %v283_v44 = vpop.eup %282  ;;  %v127_v45 = vxor.u32 2147483648, %v281_v43 }
  0x63   :  { %v124_v47 = vxor.u32 2147483648, %v283_v44 }
  0x64   :  { %v128_v6 = vsel %vm126_vm2, %v127_v45, %v283_v44 }
  0x65   :  { %v125_v48 = vsel %vm123_vm3, %v281_v43, %v124_v47 }
  0x66   :  { %v129_v49 = vsel %vm122_vm4, %v125_v48, %v128_v6 }
  0x67   :  { %v130_v50 = vsel %vm119_vm5, nan, %v129_v49 }
  0x68   :  { %235 = vst [vmem:[#allocation5] sm:$0xff] %v130_v50  ;;  %v285_v51 = vpop.eup %284 }
  0x69   :  { %v287_v52 = vpop.eup %286  ;;  %v231_v53 = vxor.u32 2147483648, %v285_v51 }
  0x6a   :  { %v228_v54 = vxor.u32 2147483648, %v287_v52 }
  0x6b   :  { %v232_v55 = vsel %vm230_vm6, %v231_v53, %v287_v52 }
  0x6c   :  { %v229_v56 = vsel %vm227_vm7, %v285_v51, %v228_v54 }
  0x6d   :  { %v233_v2 = vsel %vm226_vm8, %v229_v56, %v232_v55 }
  0x6e   :  { %v234_v57 = vsel %vm223_vm9, nan, %v233_v2 }
  0x6f   :  { %236 = vst [vmem:[#allocation5 + $0x8] sm:$0xff] %v234_v57 }
  0x70   :  { %321 = shalt.err (!%p318_p12)
}
  0x71   :  { %s322_s24 = scalar_lea.hbm %s457_s1, 256 }
  0x72   :  { %p323_p13 = scmp.ne.s32.totalorder %s457_s1, %s322_s24  ;;  %p326_p0 = scmp.lt.u32.totalorder %s322_s24, %s457_s1 }
  0x74   :  { %p328_p1 = pnand %p326_p0, %p323_p13 }
  0x76   :  { %331 = shalt.err (!%p328_p1)
}
  0x77   :  { %248 = dma.vmem_to_hbm [thread:$0]  %s243_s20, 256, %s457_s1, [#allocation4], %s337_s16, %s337_s16, %s338_s17  }
  0x78   :  { %334 = dma.done.wait [#allocation4], 256  }
  0x79   :  { %335 = vsyncadd [#allocation4], 4294967040 }
  0x7a   :  { %252 = vsyncpa [#allocation3], 1 }
  0x7b   :  { %253 = vsyncpa [#allocation4], 1 }

</bundles_post_ra>
